<compile_context>
chip_gen: v7x
topology: tpu7x:2x2x1
jax: 0.10.0
libtpu: 0.0.40
codegen_flags: <defaults>
</compile_context>

<pallas_src>
import jax
import jax.numpy as jnp
from jax.experimental import pallas as pl
from jax.experimental.pallas import tpu as pltpu


def _round_up(n: int, m: int) -> int:
    return ((n + m - 1) // m) * m


def _mlp_kernel(x_ref, w1_ref, b1_ref, w2_ref, b2_ref, w3_ref, b3_ref, o_ref):
    # x_ref: [TB, D] bf16 (D unpadded); weights bf16; biases f32; output f32.
    x = x_ref[...]
    h1 = jnp.dot(x, w1_ref[...], preferred_element_type=jnp.float32) + b1_ref[...]
    h1 = jnp.maximum(h1, 0.0)                                  # ReLU (f32)
    h2 = jnp.dot(h1.astype(w2_ref.dtype), w2_ref[...],
                 preferred_element_type=jnp.float32) + b2_ref[...]
    h2 = jnp.maximum(h2, 0.0)                                  # ReLU (f32)
    o_ref[...] = jnp.dot(h2.astype(w3_ref.dtype), w3_ref[...],
                         preferred_element_type=jnp.float32) + b3_ref[...]


def make_net_forward(params, *, block_b=256, weight_dtype=jnp.bfloat16):
    """Pad/cast params ONCE; return a jitted forward: x[B,xdim,ydim] -> [B, xdim*ydim]."""
    w1, b1, w2, b2, w3, b3 = params
    D, H = w1.shape          # in-features (xdim*ydim), hidden (first_fc_out)
    Do = w3.shape[1]         # out-features (= xdim*ydim)
    Hp = _round_up(H, 128)   # hidden padded to full lanes
    Dop = _round_up(Do, 128)  # lane-dense output width

    # One-time pad + cast (exact: padded rows/cols contribute 0).
    w1_p = jnp.zeros((D, Hp), weight_dtype).at[:, :H].set(w1.astype(weight_dtype))
    w2_p = jnp.zeros((Hp, Hp), weight_dtype).at[:H, :H].set(w2.astype(weight_dtype))
    w3_p = jnp.zeros((Hp, Dop), weight_dtype).at[:H, :Do].set(w3.astype(weight_dtype))
    b1_p = jnp.zeros((1, Hp), jnp.float32).at[:, :H].set(b1)
    b2_p = jnp.zeros((1, Hp), jnp.float32).at[:, :H].set(b2)
    b3_p = jnp.zeros((1, Dop), jnp.float32).at[:, :Do].set(b3)

    # Vreg-pressure guard: f32 h1/h2 are (TB,128) = TB/8 vregs each; cap TB at 256.
    tb_cap = min(block_b, 256)

    def forward(x):
        B = x.shape[0]
        x_flat = x.reshape(B, D).astype(weight_dtype)         # no feature padding (K=D)
        TB = min(tb_cap, _round_up(B, 8))
        Bp = _round_up(B, TB)
        x_p = jnp.pad(x_flat, ((0, Bp - B), (0, 0)))          # batch pad only (often a no-op)

        resident = lambda shape: pl.BlockSpec(shape, lambda i: (0, 0))  # stays in VMEM
        out_p = pl.pallas_call(
            _mlp_kernel,
            out_shape=jax.ShapeDtypeStruct((Bp, Dop), jnp.float32),
            grid=(Bp // TB,),
            in_specs=[
                pl.BlockSpec((TB, D), lambda i: (i, 0)),      # x tile, pipelined over batch
                resident((D, Hp)),                             # w1
                resident((1, Hp)),                             # b1
                resident((Hp, Hp)),                            # w2
                resident((1, Hp)),                             # b2
                resident((Hp, Dop)),                           # w3
                resident((1, Dop)),                            # b3
            ],
            out_specs=pl.BlockSpec((TB, Dop), lambda i: (i, 0)),
            compiler_params=pltpu.CompilerParams(
                dimension_semantics=("parallel",),             # v7x 2-TC split when grid >= 2
            ),
        )(x_p, w1_p, b1_p, w2_p, b2_p, w3_p, b3_p)
        return out_p[:B, :Do]                                  # fused slice (inside jit)

    return jax.jit(forward)


def init_params(key, xdim, ydim, first_fc_out=128):
    """Deterministic init mimicking nn.Linear default (uniform +/- 1/sqrt(fan_in)).
    Weights stored transposed relative to PyTorch: (in_features, out_features)."""
    D = xdim * ydim
    H = first_fc_out

    def linear(key, fan_in, fan_out):
        kw, kb = jax.random.split(key)
        bound = 1.0 / jnp.sqrt(fan_in)
        w = jax.random.uniform(kw, (fan_in, fan_out), jnp.float32, -bound, bound)
        b = jax.random.uniform(kb, (1, fan_out), jnp.float32, -bound, bound)
        return w, b

    k1, k2, k3 = jax.random.split(key, 3)
    w1, b1 = linear(k1, D, H)   # fc1: D -> H
    w2, b2 = linear(k2, H, H)   # fc2: H -> H
    w3, b3 = linear(k3, H, D)   # fc3: H -> D
    return (w1, b1, w2, b2, w3, b3)


def _reference_forward_f32(x, params):
    """Plain-JAX f32 reference of the PyTorch forward pass."""
    w1, b1, w2, b2, w3, b3 = params
    xf = x.reshape(x.shape[0], -1)
    h1 = jnp.maximum(xf @ w1 + b1, 0.0)
    h2 = jnp.maximum(h1 @ w2 + b2, 0.0)
    return h2 @ w3 + b3


def _reference_forward_matched(x, params, weight_dtype=jnp.bfloat16):
    """Plain-JAX reference with the SAME bf16 rounding as the kernel
    (bf16 matmul inputs, f32 accumulation, f32 bias/ReLU)."""
    w1, b1, w2, b2, w3, b3 = params
    xf = x.reshape(x.shape[0], -1).astype(weight_dtype)
    h1 = jnp.dot(xf, w1.astype(weight_dtype),
                 preferred_element_type=jnp.float32) + b1
    h1 = jnp.maximum(h1, 0.0)
    h2 = jnp.dot(h1.astype(weight_dtype), w2.astype(weight_dtype),
                 preferred_element_type=jnp.float32) + b2
    h2 = jnp.maximum(h2, 0.0)
    return jnp.dot(h2.astype(weight_dtype), w3.astype(weight_dtype),
                   preferred_element_type=jnp.float32) + b3


if __name__ == "__main__":
    xdim, ydim = 8, 8          # minesweeper board -> flattened feature dim 64
    key = jax.random.PRNGKey(0)
    k_params, k_x1, k_x2 = jax.random.split(key, 3)

    params = init_params(k_params, xdim, ydim)
    net_forward = make_net_forward(params)        # pads/casts weights once, jitted forward

    # Small case (batch=2, single grid step).
    x = jax.random.randint(k_x1, (2, xdim, ydim), -1, 9).astype(jnp.float32)
    out = jax.block_until_ready(net_forward(x))
    assert out.shape == (2, xdim * ydim)
    assert jnp.allclose(out, _reference_forward_matched(x, params), atol=1e-3, rtol=1e-3)
    assert jnp.allclose(out, _reference_forward_f32(x, params), atol=5e-2, rtol=5e-2)

    # Non-multiple batch (exercises batch padding + multi-step "parallel" grid).
    x2 = jax.random.uniform(k_x2, (300, xdim, ydim), jnp.float32, -1.0, 9.0)
    out2 = jax.block_until_ready(net_forward(x2))
    assert out2.shape == (300, xdim * ydim)
    assert jnp.allclose(out2, _reference_forward_matched(x2, params), atol=2e-3, rtol=2e-3)

    print("KERNEL_OK")
</pallas_src>

<mosaic_0001>
module attributes {stable_mosaic.version = 11 : i64} {
  func.func @_mlp_kernel(%arg0: i32, %arg1: memref<8x64xbf16, #tpu.memory_space<vmem>>, %arg2: memref<64x128xbf16, #tpu.memory_space<vmem>>, %arg3: memref<1x128xf32, #tpu.memory_space<vmem>>, %arg4: memref<128x128xbf16, #tpu.memory_space<vmem>>, %arg5: memref<1x128xf32, #tpu.memory_space<vmem>>, %arg6: memref<128x128xbf16, #tpu.memory_space<vmem>>, %arg7: memref<1x128xf32, #tpu.memory_space<vmem>>, %arg8: memref<8x128xf32, #tpu.memory_space<vmem>>) attributes {dimension_semantics = [#tpu.dimension_semantics<parallel>], iteration_bounds = array<i64: 1>, scalar_prefetch = 0 : i64, scratch_operands = 0 : i64, tpu.core_type = #tpu.core_type<tc>, window_params = [{transform_indices = @transform_0, window_bounds = array<i64: 8, 64>}, {pipeline_mode = #tpu.pipeline_mode<synchronous>, transform_indices = @transform_1, window_bounds = array<i64: 64, 128>}, {pipeline_mode = #tpu.pipeline_mode<synchronous>, transform_indices = @transform_2, window_bounds = array<i64: 1, 128>}, {pipeline_mode = #tpu.pipeline_mode<synchronous>, transform_indices = @transform_3, window_bounds = array<i64: 128, 128>}, {pipeline_mode = #tpu.pipeline_mode<synchronous>, transform_indices = @transform_4, window_bounds = array<i64: 1, 128>}, {pipeline_mode = #tpu.pipeline_mode<synchronous>, transform_indices = @transform_5, window_bounds = array<i64: 128, 128>}, {pipeline_mode = #tpu.pipeline_mode<synchronous>, transform_indices = @transform_6, window_bounds = array<i64: 1, 128>}, {transform_indices = @transform_7, window_bounds = array<i64: 8, 128>}]} {
    %c0 = arith.constant 0 : index
    %c0_0 = arith.constant 0 : index
    %0 = vector.load %arg1[%c0, %c0_0] : memref<8x64xbf16, #tpu.memory_space<vmem>>, vector<8x64xbf16>
    %c0_1 = arith.constant 0 : index
    %c0_2 = arith.constant 0 : index
    %1 = vector.load %arg2[%c0_1, %c0_2] : memref<64x128xbf16, #tpu.memory_space<vmem>>, vector<64x128xbf16>
    %cst = arith.constant dense<0.000000e+00> : vector<8x128xf32>
    %2 = tpu.matmul %0, %1, %cst {dimension_numbers = #tpu.dot_dimension_numbers<[1], [0], [0], [1], [0, 0, 1, 1], [], []>} : vector<8x64xbf16>, vector<64x128xbf16>, vector<8x128xf32> -> vector<8x128xf32>
    %c0_3 = arith.constant 0 : index
    %c0_4 = arith.constant 0 : index
    %3 = vector.load %arg3[%c0_3, %c0_4] : memref<1x128xf32, #tpu.memory_space<vmem>>, vector<1x128xf32>
    %4 = vector.broadcast %3 : vector<1x128xf32> to vector<8x128xf32>
    %5 = arith.addf %2, %4 : vector<8x128xf32>
    %cst_5 = arith.constant 0.000000e+00 : f32
    %6 = vector.broadcast %cst_5 : f32 to vector<8x128xf32>
    %7 = arith.maximumf %5, %6 : vector<8x128xf32>
    %8 = arith.truncf %7 : vector<8x128xf32> to vector<8x128xbf16>
    %c0_6 = arith.constant 0 : index
    %c0_7 = arith.constant 0 : index
    %9 = vector.load %arg4[%c0_6, %c0_7] : memref<128x128xbf16, #tpu.memory_space<vmem>>, vector<128x128xbf16>
    %cst_8 = arith.constant dense<0.000000e+00> : vector<8x128xf32>
    %10 = tpu.matmul %8, %9, %cst_8 {dimension_numbers = #tpu.dot_dimension_numbers<[1], [0], [0], [1], [0, 0, 1, 1], [], []>} : vector<8x128xbf16>, vector<128x128xbf16>, vector<8x128xf32> -> vector<8x128xf32>
    %c0_9 = arith.constant 0 : index
    %c0_10 = arith.constant 0 : index
    %11 = vector.load %arg5[%c0_9, %c0_10] : memref<1x128xf32, #tpu.memory_space<vmem>>, vector<1x128xf32>
    %12 = vector.broadcast %11 : vector<1x128xf32> to vector<8x128xf32>
    %13 = arith.addf %10, %12 : vector<8x128xf32>
    %cst_11 = arith.constant 0.000000e+00 : f32
    %14 = vector.broadcast %cst_11 : f32 to vector<8x128xf32>
    %15 = arith.maximumf %13, %14 : vector<8x128xf32>
    %16 = arith.truncf %15 : vector<8x128xf32> to vector<8x128xbf16>
    %c0_12 = arith.constant 0 : index
    %c0_13 = arith.constant 0 : index
    %17 = vector.load %arg6[%c0_12, %c0_13] : memref<128x128xbf16, #tpu.memory_space<vmem>>, vector<128x128xbf16>
    %cst_14 = arith.constant dense<0.000000e+00> : vector<8x128xf32>
    %18 = tpu.matmul %16, %17, %cst_14 {dimension_numbers = #tpu.dot_dimension_numbers<[1], [0], [0], [1], [0, 0, 1, 1], [], []>} : vector<8x128xbf16>, vector<128x128xbf16>, vector<8x128xf32> -> vector<8x128xf32>
    %c0_15 = arith.constant 0 : index
    %c0_16 = arith.constant 0 : index
    %19 = vector.load %arg7[%c0_15, %c0_16] : memref<1x128xf32, #tpu.memory_space<vmem>>, vector<1x128xf32>
    %20 = vector.broadcast %19 : vector<1x128xf32> to vector<8x128xf32>
    %21 = arith.addf %18, %20 : vector<8x128xf32>
    %c0_17 = arith.constant 0 : index
    %c0_18 = arith.constant 0 : index
    %22 = vector.load %arg8[%c0_17, %c0_18] : memref<8x128xf32, #tpu.memory_space<vmem>>, vector<8x128xf32>
    tpu.vector_store %arg8[%c0_17, %c0_18], %21 {strides = array<i32>} : memref<8x128xf32, #tpu.memory_space<vmem>>, vector<8x128xf32>,
    return
  }
  func.func @transform_0(%arg0: i32) -> (i32, i32) {
    %c0_i32 = arith.constant 0 : i32
    %c0_i32_0 = arith.constant 0 : i32
    return %arg0, %c0_i32 : i32, i32
  }
  func.func @transform_1(%arg0: i32) -> (i32, i32) {
    %c0_i32 = arith.constant 0 : i32
    %c0_i32_0 = arith.constant 0 : i32
    %c0_i32_1 = arith.constant 0 : i32
    return %c0_i32, %c0_i32_0 : i32, i32
  }
  func.func @transform_2(%arg0: i32) -> (i32, i32) {
    %c0_i32 = arith.constant 0 : i32
    %c0_i32_0 = arith.constant 0 : i32
    %c0_i32_1 = arith.constant 0 : i32
    return %c0_i32, %c0_i32_0 : i32, i32
  }
  func.func @transform_3(%arg0: i32) -> (i32, i32) {
    %c0_i32 = arith.constant 0 : i32
    %c0_i32_0 = arith.constant 0 : i32
    %c0_i32_1 = arith.constant 0 : i32
    return %c0_i32, %c0_i32_0 : i32, i32
  }
  func.func @transform_4(%arg0: i32) -> (i32, i32) {
    %c0_i32 = arith.constant 0 : i32
    %c0_i32_0 = arith.constant 0 : i32
    %c0_i32_1 = arith.constant 0 : i32
    return %c0_i32, %c0_i32_0 : i32, i32
  }
  func.func @transform_5(%arg0: i32) -> (i32, i32) {
    %c0_i32 = arith.constant 0 : i32
    %c0_i32_0 = arith.constant 0 : i32
    %c0_i32_1 = arith.constant 0 : i32
    return %c0_i32, %c0_i32_0 : i32, i32
  }
  func.func @transform_6(%arg0: i32) -> (i32, i32) {
    %c0_i32 = arith.constant 0 : i32
    %c0_i32_0 = arith.constant 0 : i32
    %c0_i32_1 = arith.constant 0 : i32
    return %c0_i32, %c0_i32_0 : i32, i32
  }
  func.func @transform_7(%arg0: i32) -> (i32, i32) {
    %c0_i32 = arith.constant 0 : i32
    %c0_i32_0 = arith.constant 0 : i32
    return %arg0, %c0_i32 : i32, i32
  }
}

</mosaic_0001>

<bundles_post_ra>
// kernel: forward.1
= control target key start
LH: loop header
LB: loop body
LE: loop exit
PB: predicated region body
PF: predicated region fallthrough
CT: control target
= control target key end

     0   :  { %12 = vsyncpa [#allocation3], 0  ;;  %s680_s0 = inlined_call_operand.vmem [shape: bf16[8,64], index: 0, kind: input, shape index: {}]   ;;  %s681_s1 = inlined_call_operand.hbm [shape: bf16[64,128], index: 1, kind: input, shape index: {}]   ;;  %s682_s2 = inlined_call_operand.vmem [shape: f32[1,128], index: 2, kind: input, shape index: {}]   ;;  %s683_s3 = inlined_call_operand.hbm [shape: bf16[128,128], index: 3, kind: input, shape index: {}]   ;;  %s684_s4 = inlined_call_operand.vmem [shape: f32[1,128], index: 4, kind: input, shape index: {}]   ;;  %s685_s5 = inlined_call_operand.vmem [shape: bf16[128,128], index: 5, kind: input, shape index: {}]   ;;  %s686_s6 = inlined_call_operand.vmem [shape: f32[1,128], index: 6, kind: input, shape index: {}]   ;;  %s687_s7 = inlined_call_operand.vmem [shape: f32[8,128], index: 7, kind: output, shape index: {}]  }
   0x1   :  { %13 = vsyncpa [#allocation5], 0  ;;  %s545_s24 = smov [#allocation2]   ;;  %s497_s28 = scalar_lea.hbm %s681_s1, 512 }
   0x2   :  { %s21_s25 = sshll.u32 %s545_s24, 4  ;;  %p498_p0 = scmp.ne.s32.totalorder %s681_s1, %s497_s28  ;;  %s22_s25 = int_to_ptr.vmem [resolvable:$true] %s21_s25 }
   0x3   :  { %p501_p1 = scmp.lt.u32.totalorder %s497_s28, %s681_s1 }
   0x5   :  { %p503_p2 = pnand %p501_p1, %p498_p0 }
   0x7   :  { %506 = shalt.err (!%p503_p2)
}
   0x8   :  { %s507_s10 = scalar_lea.vmem %s22_s25, 512  ;;  %p512_p4 = scmp.lt.s32.totalorder %s22_s25, %s22_s25 }
   0x9   :  { %p508_p3 = scmp.ne.s32.totalorder %s22_s25, %s507_s10  ;;  %p513_p5 = scmp.lt.s32.totalorder %s507_s10, %s507_s10 }
   0xb   :  { %p514_p6 = por %p513_p5, %p512_p4 }
   0xd   :  { %p515_p7 = pnand %p514_p6, %p508_p3 }
   0xf   :  { %518 = shalt.err (!%p515_p7)
}
  0x10   :  { %s546_s11 = smov 64   ;;  %s547_s12 = smov 4  }
  0x11   :  { %27 = dma.hbm_to_vmem [thread:$0]  %s681_s1, 512, %s22_s25, [#allocation3], %s546_s11, %s546_s11, %s547_s12  }
  0x12   :  { %s548_s15 = smov [#allocation4]   ;;  %s519_s19 = scalar_lea.hbm %s683_s3, 1024 }
  0x13   :  { %s35_s16 = sshll.u32 %s548_s15, 4  ;;  %p520_p8 = scmp.ne.s32.totalorder %s683_s3, %s519_s19  ;;  %s36_s16 = int_to_ptr.vmem [resolvable:$true] %s35_s16 }
  0x14   :  { %p523_p9 = scmp.lt.u32.totalorder %s519_s19, %s683_s3 }
  0x16   :  { %p525_p10 = pnand %p523_p9, %p520_p8 }
  0x18   :  { %528 = shalt.err (!%p525_p10)
}
  0x19   :  { %s529_s24 = scalar_lea.vmem %s36_s16, 1024  ;;  %p534_p12 = scmp.lt.s32.totalorder %s36_s16, %s36_s16 }
  0x1a   :  { %p530_p11 = scmp.ne.s32.totalorder %s36_s16, %s529_s24  ;;  %p535_p13 = scmp.lt.s32.totalorder %s529_s24, %s529_s24 }
  0x1c   :  { %p536_p0 = por %p535_p13, %p534_p12 }
  0x1e   :  { %p537_p1 = pnand %p536_p0, %p530_p11 }
  0x20   :  { %540 = shalt.err (!%p537_p1)
}
  0x21   :  { %41 = dma.hbm_to_vmem [thread:$0]  %s683_s3, 1024, %s36_s16, [#allocation5], %s546_s11, %s546_s11, %s547_s12  }
  0x22   :  { %541 = dma.done.wait [#allocation3], 512  }
  0x23   :  { %542 = vsyncadd [#allocation3], 4294966784 }
  0x24   :  { %543 = dma.done.wait [#allocation5], 1024  }
  0x25   :  { %544 = vsyncadd [#allocation5], 4294966272  ;;  %v549_v0 = vmov 0.0   ;;  %vm550_vm0 = vmmov 0   ;;  %v477_v1 = vld [vmem:[#allocation2] sm:$0xff]   ;;  %v478_v2 = vld [vmem:[#allocation2 + $0x8] sm:$0xff]  }
  0x26   :  { %419 = vmatprep.subr.bf16.mxu0 %v549_v0  ;;  %427 = vmatprep.mubr.msk.bf16.mxu0 %vm550_vm0, %v549_v0  ;;  %v481_v3 = vld [vmem:[#allocation4] sm:$0xff]   ;;  %v479_v4 = vld [vmem:[#allocation2 + $0x10] sm:$0xff]   ;;  %v482_v5 = vld [vmem:[#allocation4 + $0x8] sm:$0xff]   ;;  %vm95_vm1 = vcmask 523264  }
  0x27   :  { %431 = vmatprep.subr.bf16.mxu1 %v549_v0  ;;  %447 = vmatprep.mubr.msk.bf16.mxu1 %vm550_vm0, %v549_v0  ;;  %v480_v6 = vld [vmem:[#allocation2 + $0x18] sm:$0xff]   ;;  %v483_v7 = vld [vmem:[#allocation4 + $0x10] sm:$0xff]   ;;  %v55_v8 = vld [vmem:[%s680_s0] sm:$0xf] }
  0x28   :  { %420 = vmatpush3.bf16.msra.mxu0 %v477_v1  ;;  %432 = vmatpush3.bf16.msra.mxu1 %v481_v3  ;;  %v484_v9 = vld [vmem:[#allocation4 + $0x18] sm:$0xff]   ;;  %v485_v10 = vld [vmem:[#allocation4 + $0x20] sm:$0xff]   ;;  %v486_v11 = vld [vmem:[#allocation4 + $0x28] sm:$0xff]  }
  0x29   :  { %421 = vmatprep.subr.bf16.mxu0 %v549_v0  ;;  %433 = vmatprep.subr.bf16.mxu1 %v549_v0  ;;  %v487_v12 = vld [vmem:[#allocation4 + $0x30] sm:$0xff]   ;;  %v488_v13 = vld [vmem:[#allocation4 + $0x38] sm:$0xff]   ;;  %v489_v14 = vld [vmem:[%s685_s5] sm:$0xff]  }
  0x2a   :  { %v490_v15 = vld [vmem:[%s685_s5 + $0x8] sm:$0xff]   ;;  %v491_v16 = vld [vmem:[%s685_s5 + $0x10] sm:$0xff]   ;;  %v492_v17 = vld [vmem:[%s685_s5 + $0x18] sm:$0xff]  }
  0x2b   :  { %v493_v18 = vld [vmem:[%s685_s5 + $0x20] sm:$0xff]   ;;  %v494_v19 = vld [vmem:[%s685_s5 + $0x28] sm:$0xff]   ;;  %v495_v28 = vld [vmem:[%s685_s5 + $0x30] sm:$0xff]  }
  0x2c   :  { %422 = vmatpush3.bf16.msra.mxu0 %v478_v2  ;;  %434 = vmatpush3.bf16.msra.mxu1 %v482_v5  ;;  %v372_v20 = vld [vmem:[%s682_s2] ss:$0 sm:$0xff]  ;;  %v496_v29 = vld [vmem:[%s685_s5 + $0x38] sm:$0xff]  }
  0x2d   :  { %423 = vmatprep.subr.bf16.mxu0 %v549_v0  ;;  %435 = vmatprep.subr.bf16.mxu1 %v549_v0  ;;  %v378_v30 = vld [vmem:[%s684_s4] ss:$0 sm:$0xff] }
  0x2e   :  { %v387_v38 = vld [vmem:[%s686_s6] ss:$0 sm:$0xff] }
  0x30   :  { %424 = vmatpush3.bf16.msra.mxu0 %v479_v4  ;;  %436 = vmatpush3.bf16.msra.mxu1 %v483_v7 }
  0x31   :  { %425 = vmatprep.subr.bf16.mxu0 %v549_v0  ;;  %437 = vmatprep.subr.bf16.mxu1 %v549_v0 }
  0x34   :  { %426 = vmatpush3.bf16.msra.mxu0 %v480_v6  ;;  %438 = vmatpush3.bf16.msra.mxu1 %v484_v9 }
  0x35   :  { %451 = vmatprep.subr.bf16.mxu0 %v549_v0  ;;  %439 = vmatprep.subr.bf16.mxu1 %v549_v0 }
  0x37   :  { %428 = vmatmul.mubr.msk.bf16.vlgmr.msra.gmra.mrb[0].mxu0 %vm95_vm1, %v55_v8 }
  0x38   :  { %467 = vmatprep.mubr.msk.bf16.mxu0 %vm550_vm0, %v549_v0  ;;  %440 = vmatpush3.bf16.msra.mxu1 %v485_v10 }
  0x39   :  { %441 = vmatprep.subr.bf16.mxu1 %v549_v0  ;;  %452 = vmatpush3.bf16.msra.mxu0 %v489_v14 }
  0x3a   :  { %453 = vmatprep.subr.bf16.mxu0 %v549_v0 }
  0x3c   :  { %442 = vmatpush3.bf16.msra.mxu1 %v486_v11 }
  0x3d   :  { %443 = vmatprep.subr.bf16.mxu1 %v549_v0  ;;  %454 = vmatpush3.bf16.msra.mxu0 %v490_v15 }
  0x3e   :  { %455 = vmatprep.subr.bf16.mxu0 %v549_v0 }
  0x40   :  { %444 = vmatpush3.bf16.msra.mxu1 %v487_v12 }
  0x41   :  { %445 = vmatprep.subr.bf16.mxu1 %v549_v0  ;;  %456 = vmatpush3.bf16.msra.mxu0 %v491_v16 }
  0x42   :  { %457 = vmatprep.subr.bf16.mxu0 %v549_v0 }
  0x44   :  { %446 = vmatpush3.bf16.msra.mxu1 %v488_v13 }
  0x45   :  { %458 = vmatpush3.bf16.msra.mxu0 %v492_v17 }
  0x46   :  { %459 = vmatprep.subr.bf16.mxu0 %v549_v0 }
  0x49   :  { %460 = vmatpush3.bf16.msra.mxu0 %v493_v18 }
  0x4a   :  { %461 = vmatprep.subr.bf16.mxu0 %v549_v0 }
  0x4d   :  { %462 = vmatpush3.bf16.msra.mxu0 %v494_v19 }
  0x4e   :  { %463 = vmatprep.subr.bf16.mxu0 %v549_v0 }
  0x51   :  { %464 = vmatpush3.bf16.msra.mxu0 %v495_v28 }
  0x52   :  { %465 = vmatprep.subr.bf16.mxu0 %v549_v0 }
  0x55   :  { %466 = vmatpush3.bf16.msra.mxu0 %v496_v29 }
 0x10a   :  { %v133_v21 = vpop.f32.mrb[0].mxu0 }
 0x10b   :  { %v134_v22 = vadd.f32 %v372_v20, %v133_v21  ;;  %v429_v23 = vpop.f32.mrb[1].mxu0 }
 0x10c   :  { %v136_v24 = vpop.f32.mrb[2].mxu0 }
 0x10d   :  { %v139_v25 = vmax.f32 %v134_v22, 0.0  ;;  %v430_v26 = vpop.f32.mrb[3].mxu0 }
 0x10f   :  { %v140_v27 = vpack.c.bf16 %v139_v25, %v139_v25 }
 0x111   :  { %448 = vmatmul.mubr.bf16.vlgmr.msra.gmra.mrb[0].mxu1 %v140_v27 }
 0x1e4   :  { %v246_v31 = vpop.f32.mrb[0].mxu1 }
 0x1e5   :  { %v247_v32 = vadd.f32 %v378_v30, %v246_v31  ;;  %v449_v33 = vpop.f32.mrb[1].mxu1 }
 0x1e6   :  { %v249_v34 = vpop.f32.mrb[2].mxu1 }
 0x1e7   :  { %v252_v35 = vmax.f32 %v247_v32, 0.0  ;;  %v450_v36 = vpop.f32.mrb[3].mxu1 }
 0x1e9   :  { %v253_v37 = vpack.c.bf16 %v252_v35, %v252_v35 }
 0x1eb   :  { %468 = vmatmul.mubr.bf16.vlgmr.msra.gmra.mrb[4].mxu0 %v253_v37 }
 0x2be   :  { %v359_v39 = vpop.f32.mrb[4].mxu0 }
 0x2bf   :  { %v360_v40 = vadd.f32 %v387_v38, %v359_v39  ;;  %v469_v41 = vpop.f32.mrb[5].mxu0 }
 0x2c0   :  { %v362_v42 = vpop.f32.mrb[6].mxu0 }
 0x2c1   :  { %365 = vst [vmem:[%s687_s7] sm:$0xff] %v360_v40  ;;  %v470_v43 = vpop.f32.mrb[7].mxu0 }
 0x2c2   :  { %370 = vsyncpa [#allocation3], 1 }
 0x2c3   :  { %371 = vsyncpa [#allocation5], 1 }

</bundles_post_ra>
